<compile_context>
chip_gen: v5e
topology: v5e:2x2
jax: 0.10.0
libtpu: 0.0.40
codegen_flags: <defaults>
</compile_context>

<pallas_src>
import jax
import jax.numpy as jnp
from jax import lax
from jax.experimental import pallas as pl
from jax.experimental.pallas import tpu as pltpu

EPS = 1e-5
LANE = 128                        # output-channel axes are zero-padded to this
TK = LANE                         # K tile for the conv1 matmul
VMEM_LIMIT = 32 * 1024 * 1024     # safe on v5e/v6e (128 MiB) and v7x (64 MiB)


def _round_up(x, m):
    return (x + m - 1) // m * m


def _pick_tm(m, target=512):
    """Largest multiple-of-8 divisor of m that is <= target, but keep >= 2 M
    tiles so the 'parallel' M axis can shard across both v7x TensorCores."""
    def largest(cap):
        for c in range(max(1, min(cap, m)), 0, -1):
            if m % c == 0 and c % 8 == 0:
                return c
        return None
    best = largest(target)
    if best is None:
        return m                           # tiny M: one full-extent tile
    if m // best < 2:
        smaller = largest(m // 2)
        if smaller is not None:
            return smaller
    return best


# ----------------------------- Pallas kernels -----------------------------

def conv_stats_kernel(p_ref, w_ref, y_ref, sm_ref, sv_ref, acc_ref):
    """One (M-tile, K-tile) step of y = patches @ W with fused BN statistics.

    Epilogue (last K step) writes the y tile and per-tile per-channel
    (mean, sum-of-squared-deviations) partials (Chan-combined later in glue).
    """
    k = pl.program_id(1)

    @pl.when(k == 0)
    def _():
        acc_ref[...] = jnp.zeros_like(acc_ref)

    acc_ref[...] += jnp.dot(p_ref[...], w_ref[...],
                            preferred_element_type=jnp.float32)

    @pl.when(k == pl.num_programs(1) - 1)
    def _():
        acc = acc_ref[...]
        y_ref[...] = acc.astype(y_ref.dtype)
        m = jnp.mean(acc, axis=0, keepdims=True)              # (1, C)
        d = acc - m
        sm_ref[...] = m.reshape(1, 1, -1)
        sv_ref[...] = jnp.sum(d * d, axis=0, keepdims=True).reshape(1, 1, -1)


def bn1_conv2_stats_kernel(y1p_ref, s1_ref, t1_ref, w2_ref,
                           y2_ref, sm_ref, sv_ref):
    """Fused: a1 = relu(y1*scale1 + shift1); y2 = conv2_3x3(a1); BN2 partials.

    y1p_ref : (1, H1+2, W1+2, C) spatially zero-padded conv1 output (pre-BN)
    s1/t1   : (1, C) hoisted bn1 scale / shift
    w2_ref  : (9*C, C) conv2 weights, rows ordered (kh, kw, cin)
    y2_ref  : (1, H1*W1, C) conv2 output (pre-BN); sm/sv: (1, 1, C) stats.
    """
    _, Hp, Wp, C = y1p_ref.shape
    H1, W1 = Hp - 2, Wp - 2

    # bn1 affine + ReLU fused into the conv2 LHS (a1 never round-trips HBM).
    y1 = y1p_ref[...].reshape(Hp, Wp, C).astype(jnp.float32)
    a = jnp.maximum(y1 * s1_ref[...] + t1_ref[...], 0.0)
    # Spatial zero-padding was applied before BN; re-zero the 1-pixel border
    # (relu(shift) != 0 there).  Static mask, built once per grid step.
    row = lax.broadcasted_iota(jnp.int32, (Hp, Wp, C), 0)
    col = lax.broadcasted_iota(jnp.int32, (Hp, Wp, C), 1)
    interior = (row >= 1) & (row <= Hp - 2) & (col >= 1) & (col <= Wp - 2)
    a = jnp.where(interior, a, 0.0).astype(w2_ref.dtype)

    # 3x3 conv as 9 shifted-window matmuls accumulated in f32 (no im2col tensor).
    acc = jnp.zeros((H1 * W1, C), jnp.float32)
    for kh in range(3):
        for kw in range(3):
            lhs = a[kh:kh + H1, kw:kw + W1, :].reshape(H1 * W1, C)
            w_tap = w2_ref[(kh * 3 + kw) * C:(kh * 3 + kw + 1) * C, :]
            acc = acc + jnp.dot(lhs, w_tap, preferred_element_type=jnp.float32)

    y2_ref[...] = acc.reshape(1, H1 * W1, C).astype(y2_ref.dtype)
    m = jnp.mean(acc, axis=0, keepdims=True)
    d = acc - m
    sm_ref[...] = m.reshape(1, 1, -1)
    sv_ref[...] = jnp.sum(d * d, axis=0, keepdims=True).reshape(1, 1, -1)


def shortcut_bn_add_relu_kernel(y_ref, s2_ref, t2_ref, xs_ref, w3_ref, b3_ref,
                                o_ref):
    """out = relu(y2*scale2 + shift2 + (xs @ w3 + b3)); shortcut never hits HBM."""
    sc = jnp.dot(xs_ref[...], w3_ref[...],
                 preferred_element_type=jnp.float32) + b3_ref[...]
    y = y_ref[...].astype(jnp.float32)
    o_ref[...] = jnp.maximum(y * s2_ref[...] + t2_ref[...] + sc,
                             0.0).astype(o_ref.dtype)


# ----------------------------- Pallas wrappers -----------------------------

def _conv_matmul_stats(patches, wmat, tm, out_dtype):
    M, K = patches.shape
    Kw, C = wmat.shape
    assert K == Kw and C == LANE and M % tm == 0 and K % TK == 0
    mt, kt = M // tm, K // TK
    return pl.pallas_call(
        conv_stats_kernel,
        grid=(mt, kt),
        in_specs=[
            pl.BlockSpec((tm, TK), lambda i, k: (i, k)),
            pl.BlockSpec((TK, C), lambda i, k: (k, 0)),
        ],
        out_specs=(
            pl.BlockSpec((tm, C), lambda i, k: (i, 0)),
            pl.BlockSpec((1, 1, C), lambda i, k: (i, 0, 0)),
            pl.BlockSpec((1, 1, C), lambda i, k: (i, 0, 0)),
        ),
        out_shape=(
            jax.ShapeDtypeStruct((M, C), out_dtype),
            jax.ShapeDtypeStruct((mt, 1, C), jnp.float32),
            jax.ShapeDtypeStruct((mt, 1, C), jnp.float32),
        ),
        scratch_shapes=[pltpu.VMEM((tm, C), jnp.float32)],
        compiler_params=pltpu.CompilerParams(
            dimension_semantics=("parallel", "arbitrary"),
            vmem_limit_bytes=VMEM_LIMIT),
    )(patches, wmat)


def _bn1_conv2_stats(y1p, scale1, shift1, w2m, out_dtype):
    N, Hp, Wp, C = y1p.shape
    M1 = (Hp - 2) * (Wp - 2)
    return pl.pallas_call(
        bn1_conv2_stats_kernel,
        grid=(N,),
        in_specs=[
            pl.BlockSpec((1, Hp, Wp, C), lambda n: (n, 0, 0, 0)),
            pl.BlockSpec((1, C), lambda n: (0, 0)),
            pl.BlockSpec((1, C), lambda n: (0, 0)),
            pl.BlockSpec((9 * C, C), lambda n: (0, 0)),
        ],
        out_specs=(
            pl.BlockSpec((1, M1, C), lambda n: (n, 0, 0)),
            pl.BlockSpec((1, 1, C), lambda n: (n, 0, 0)),
            pl.BlockSpec((1, 1, C), lambda n: (n, 0, 0)),
        ),
        out_shape=(
            jax.ShapeDtypeStruct((N, M1, C), out_dtype),
            jax.ShapeDtypeStruct((N, 1, C), jnp.float32),
            jax.ShapeDtypeStruct((N, 1, C), jnp.float32),
        ),
        compiler_params=pltpu.CompilerParams(
            dimension_semantics=("parallel",),
            vmem_limit_bytes=VMEM_LIMIT),
    )(y1p, scale1, shift1, w2m)


def _shortcut_bn_add_relu(y2, scale2, shift2, xs, w3m, b3, tm, out_dtype):
    M, C = y2.shape
    Kc = xs.shape[1]
    return pl.pallas_call(
        shortcut_bn_add_relu_kernel,
        grid=(M // tm,),
        in_specs=[
            pl.BlockSpec((tm, C), lambda i: (i, 0)),
            pl.BlockSpec((1, C), lambda i: (0, 0)),
            pl.BlockSpec((1, C), lambda i: (0, 0)),
            pl.BlockSpec((tm, Kc), lambda i: (i, 0)),
            pl.BlockSpec((Kc, C), lambda i: (0, 0)),
            pl.BlockSpec((1, C), lambda i: (0, 0)),
        ],
        out_specs=pl.BlockSpec((tm, C), lambda i: (i, 0)),
        out_shape=jax.ShapeDtypeStruct((M, C), out_dtype),
        compiler_params=pltpu.CompilerParams(
            dimension_semantics=("parallel",),
            vmem_limit_bytes=VMEM_LIMIT),
    )(y2, scale2, shift2, xs, w3m, b3)


# ----------------------------- Glue (plain JAX) -----------------------------

def _combine_stats(sm, sv, rows_per_tile, gamma, beta):
    """Chan combine of per-tile (mean, M2) partials -> per-channel scale/shift.

    Hoisted OUT of the per-tile kernels (done once on tiny (T,1,C) arrays) so
    every epilogue's per-element path is a single broadcast FMA + ReLU."""
    m_t = sm[:, 0, :].astype(jnp.float32)
    m2_t = sv[:, 0, :].astype(jnp.float32)
    total = m_t.shape[0] * rows_per_tile
    mean = jnp.mean(m_t, axis=0, keepdims=True)
    dm = m_t - mean
    var = (jnp.sum(m2_t, axis=0, keepdims=True)
           + rows_per_tile * jnp.sum(dm * dm, axis=0, keepdims=True)) / total
    scale = gamma * lax.rsqrt(var + EPS)
    shift = beta - mean * scale
    return scale, shift


def im2col(x_nhwc, ksize, stride, pad):
    """Patches -> (N*Ho*Wo, k*k*C), column order (kh, kw, c).  conv1 only."""
    N, H, W, C = x_nhwc.shape
    xp = jnp.pad(x_nhwc, ((0, 0), (pad, pad), (pad, pad), (0, 0)))
    Ho = (H + 2 * pad - ksize) // stride + 1
    Wo = (W + 2 * pad - ksize) // stride + 1
    cols = [xp[:, dh:dh + stride * Ho:stride, dw:dw + stride * Wo:stride, :]
            for dh in range(ksize) for dw in range(ksize)]
    patches = jnp.stack(cols, axis=3).reshape(N * Ho * Wo, ksize * ksize * C)
    return patches, (N, Ho, Wo)


def conv_weight_to_matrix(w_oihw, cin_pad, cout_pad=LANE):
    """(Cout,Cin,KH,KW) -> (KH*KW*cin_pad, cout_pad), rows ordered (kh, kw, cin)."""
    Cout, Cin, KH, KW = w_oihw.shape
    w = jnp.transpose(w_oihw, (2, 3, 1, 0))
    w = jnp.pad(w, ((0, 0), (0, 0), (0, cin_pad - Cin), (0, cout_pad - Cout)))
    return w.reshape(KH * KW * cin_pad, cout_pad)


def prepare_params(params):
    """Precompute lane-dense (128-padded) matrix-form weights / BN parameters."""
    p = dict(params)
    Cout, Cin = params["w1"].shape[:2]
    cinp = _round_up(Cin, 8)                  # shortcut K padded to sublane only
    w1m = conv_weight_to_matrix(params["w1"], cin_pad=Cin)        # (9*Cin, 128)
    k1 = _round_up(w1m.shape[0], TK)
    p["w1m"] = jnp.pad(w1m, ((0, k1 - w1m.shape[0]), (0, 0)))
    p["w2m"] = conv_weight_to_matrix(params["w2"], cin_pad=LANE)  # (9*128, 128)
    w3 = params["w3"][:, :, 0, 0].T                               # (Cin, Cout)
    p["w3m"] = jnp.pad(w3, ((0, cinp - Cin), (0, LANE - Cout)))   # (cinp, 128)
    p["b3p"] = jnp.pad(params["b3"], (0, LANE - Cout)).reshape(1, LANE)
    for name in ("g1", "be1", "g2", "be2"):
        p[name + "p"] = jnp.pad(params[name], (0, LANE - Cout)).reshape(1, LANE)
    p["cinp"] = cinp
    # b1 / b2 are intentionally NOT used by the Pallas path: a per-channel bias
    # added before training-mode BatchNorm cancels exactly against the batch mean.
    return p


def residual_forward(x_nchw, params, strides, *, mxu_dtype=jnp.bfloat16,
                     out_dtype=jnp.float32, tm_target=512):
    """Pallas forward of Residual (training-mode BatchNorm). NCHW in / NCHW out.

    mxu_dtype defaults to bf16 on every generation (v5e incl.); accumulation and
    all BN math stay f32.  Pass f32 for bit-accurate verification."""
    Cout = params["g1"].shape[0]
    cinp = params["cinp"]
    x = jnp.transpose(x_nchw, (0, 2, 3, 1)).astype(jnp.float32)   # NHWC
    N, H, W, Cin = x.shape

    # conv1 (3x3, stride=strides, pad=1) with fused BN1-stats epilogue.
    p0, (N, H1, W1) = im2col(x, 3, strides, 1)                    # (M, 9*Cin)
    M = N * H1 * W1
    tm = _pick_tm(M, tm_target)
    assert M % tm == 0
    k1 = params["w1m"].shape[0]
    p0 = jnp.pad(p0, ((0, 0), (0, k1 - p0.shape[1]))).astype(mxu_dtype)
    y1, sm1, sv1 = _conv_matmul_stats(p0, params["w1m"].astype(mxu_dtype),
                                      tm, mxu_dtype)
    scale1, shift1 = _combine_stats(sm1, sv1, tm, params["g1p"], params["be1p"])

    # bn1+ReLU fused into conv2 (3x3, stride=1, pad=1) with fused BN2 stats.
    # y1 is spatially zero-padded ONCE (cheap, 1.5x of y1); no a1 activation
    # and no 9x im2col tensor ever touch HBM.
    y1p = jnp.pad(y1.reshape(N, H1, W1, LANE),
                  ((0, 0), (1, 1), (1, 1), (0, 0)))
    y2, sm2, sv2 = _bn1_conv2_stats(y1p, scale1, shift1,
                                    params["w2m"].astype(mxu_dtype), mxu_dtype)
    scale2, shift2 = _combine_stats(sm2, sv2, H1 * W1,
                                    params["g2p"], params["be2p"])

    # 1x1 shortcut conv fused with bn2 affine + residual add + relu.
    xs = x[:, ::strides, ::strides, :].reshape(M, Cin)
    xs = jnp.pad(xs, ((0, 0), (0, cinp - Cin))).astype(mxu_dtype)  # pad 4 -> 8 only
    out = _shortcut_bn_add_relu(y2.reshape(M, LANE), scale2, shift2, xs,
                                params["w3m"].astype(mxu_dtype),
                                params["b3p"], tm, out_dtype)

    # Final strip/transposition kept only to honor the module's NCHW contract.
    out = out.reshape(N, H1, W1, LANE)[..., :Cout]
    return jnp.transpose(out, (0, 3, 1, 2))


# ----------------------------- Plain-JAX reference -----------------------------

def _conv_nchw(x, w, b, stride, pad):
    out = lax.conv_general_dilated(
        x, w, (stride, stride), ((pad, pad), (pad, pad)),
        dimension_numbers=("NCHW", "OIHW", "NCHW"))
    return out + b.reshape(1, -1, 1, 1)


def _bn_train(y, gamma, beta):
    mean = jnp.mean(y, axis=(0, 2, 3), keepdims=True)
    var = jnp.mean((y - mean) ** 2, axis=(0, 2, 3), keepdims=True)
    return (y - mean) / jnp.sqrt(var + EPS) * gamma.reshape(1, -1, 1, 1) \
        + beta.reshape(1, -1, 1, 1)


def residual_reference(x, params, strides):
    y = jax.nn.relu(_bn_train(_conv_nchw(x, params["w1"], params["b1"], strides, 1),
                              params["g1"], params["be1"]))
    y = _bn_train(_conv_nchw(y, params["w2"], params["b2"], 1, 1),
                  params["g2"], params["be2"])
    xs = _conv_nchw(x, params["w3"], params["b3"], strides, 0)
    return jax.nn.relu(y + xs)


# ----------------------------- Main -----------------------------

if __name__ == "__main__":
    key = jax.random.PRNGKey(0)
    k = jax.random.split(key, 12)

    # Residual(input_channels=4, num_channels=8, use_1x1conv=True, strides=2)
    Cin, Cout, strides = 4, 8, 2
    N, H, W = 2, 16, 16

    params = {
        "w1": jax.random.normal(k[0], (Cout, Cin, 3, 3), jnp.float32) * 0.1,
        "b1": jax.random.normal(k[1], (Cout,), jnp.float32) * 0.1,
        "w2": jax.random.normal(k[2], (Cout, Cout, 3, 3), jnp.float32) * 0.1,
        "b2": jax.random.normal(k[3], (Cout,), jnp.float32) * 0.1,
        "w3": jax.random.normal(k[4], (Cout, Cin, 1, 1), jnp.float32) * 0.1,
        "b3": jax.random.normal(k[5], (Cout,), jnp.float32) * 0.1,
        "g1": 1.0 + 0.1 * jax.random.normal(k[7], (Cout,), jnp.float32),
        "be1": 0.1 * jax.random.normal(k[8], (Cout,), jnp.float32),
        "g2": 1.0 + 0.1 * jax.random.normal(k[9], (Cout,), jnp.float32),
        "be2": 0.1 * jax.random.normal(k[10], (Cout,), jnp.float32),
    }
    pp = prepare_params(params)
    x = jax.random.uniform(k[6], (N, Cin, H, W), jnp.float32)

    ref = residual_reference(x, params, strides)

    # f32 MXU path: strict check (the conv biases the Pallas path drops cancel
    # exactly under training-mode BatchNorm, so outputs match the reference).
    out = jax.block_until_ready(
        residual_forward(x, pp, strides, mxu_dtype=jnp.float32))
    assert out.shape == (N, Cout, H // strides, W // strides), out.shape
    err = float(jnp.max(jnp.abs(out - ref)))
    assert jnp.allclose(out, ref, atol=1e-3, rtol=1e-3), err

    # Default path: bf16 MXU operands on all generations (v5e included), f32
    # accumulation and f32 BN epilogue math.  Loose sanity tolerance.
    out_bf16 = jax.block_until_ready(residual_forward(x, pp, strides))
    err_bf16 = float(jnp.max(jnp.abs(out_bf16 - ref)))
    assert jnp.allclose(out_bf16, ref, atol=1e-1, rtol=1e-1), err_bf16

    print("KERNEL_OK")
</pallas_src>

<mosaic_0001>
module attributes {stable_mosaic.version = 11 : i64} {
  func.func @conv_stats_kernel(%arg0: i32, %arg1: i32, %arg2: memref<64x128xf32, #tpu.memory_space<vmem>>, %arg3: memref<128x128xf32, #tpu.memory_space<vmem>>, %arg4: memref<64x128xf32, #tpu.memory_space<vmem>>, %arg5: memref<1x1x128xf32, #tpu.memory_space<vmem>>, %arg6: memref<1x1x128xf32, #tpu.memory_space<vmem>>, %arg7: memref<64x128xf32, #tpu.memory_space<vmem>>) attributes {dimension_semantics = [#tpu.dimension_semantics<parallel>, #tpu.dimension_semantics<arbitrary>], iteration_bounds = array<i64: 2, 1>, scalar_prefetch = 0 : i64, scratch_operands = 1 : i64, tpu.core_type = #tpu.core_type<tc>, window_params = [{transform_indices = @transform_0, window_bounds = array<i64: 64, 128>}, {transform_indices = @transform_1, window_bounds = array<i64: 128, 128>}, {transform_indices = @transform_2, window_bounds = array<i64: 64, 128>}, {transform_indices = @transform_3, window_bounds = array<i64: 1, 1, 128>}, {transform_indices = @transform_4, window_bounds = array<i64: 1, 1, 128>}]} {
    %c0_i32 = arith.constant 0 : i32
    %0 = arith.cmpi eq, %arg1, %c0_i32 : i32
    %1 = arith.extui %0 : i1 to i32
    %c0_i32_0 = arith.constant 0 : i32
    %2 = arith.cmpi ne, %1, %c0_i32_0 : i32
    scf.if %2 {
      %cst_10 = arith.constant 0.000000e+00 : f32
      %12 = vector.broadcast %cst_10 : f32 to vector<64x128xf32>
      %c0_11 = arith.constant 0 : index
      %c0_12 = arith.constant 0 : index
      %13 = vector.load %arg7[%c0_11, %c0_12] : memref<64x128xf32, #tpu.memory_space<vmem>>, vector<64x128xf32>
      tpu.vector_store %arg7[%c0_11, %c0_12], %12 {strides = array<i32>} : memref<64x128xf32, #tpu.memory_space<vmem>>, vector<64x128xf32>,
    } else {
    }
    %c0 = arith.constant 0 : index
    %c0_1 = arith.constant 0 : index
    %3 = vector.load %arg7[%c0, %c0_1] : memref<64x128xf32, #tpu.memory_space<vmem>>, vector<64x128xf32>
    %c0_2 = arith.constant 0 : index
    %c0_3 = arith.constant 0 : index
    %4 = vector.load %arg2[%c0_2, %c0_3] : memref<64x128xf32, #tpu.memory_space<vmem>>, vector<64x128xf32>
    %c0_4 = arith.constant 0 : index
    %c0_5 = arith.constant 0 : index
    %5 = vector.load %arg3[%c0_4, %c0_5] : memref<128x128xf32, #tpu.memory_space<vmem>>, vector<128x128xf32>
    %cst = arith.constant dense<0.000000e+00> : vector<64x128xf32>
    %6 = tpu.matmul %4, %5, %cst {dimension_numbers = #tpu.dot_dimension_numbers<[1], [0], [0], [1], [0, 0, 1, 1], [], []>} : vector<64x128xf32>, vector<128x128xf32>, vector<64x128xf32> -> vector<64x128xf32>
    %7 = arith.addf %3, %6 : vector<64x128xf32>
    %c0_6 = arith.constant 0 : index
    %c0_7 = arith.constant 0 : index
    %8 = vector.load %arg7[%c0_6, %c0_7] : memref<64x128xf32, #tpu.memory_space<vmem>>, vector<64x128xf32>
    tpu.vector_store %arg7[%c0_6, %c0_7], %7 {strides = array<i32>} : memref<64x128xf32, #tpu.memory_space<vmem>>, vector<64x128xf32>,
    %c0_i32_8 = arith.constant 0 : i32
    %9 = arith.cmpi eq, %arg1, %c0_i32_8 : i32
    %10 = arith.extui %9 : i1 to i32
    %c0_i32_9 = arith.constant 0 : i32
    %11 = arith.cmpi ne, %10, %c0_i32_9 : i32
    scf.if %11 {
      %c0_10 = arith.constant 0 : index
      %c0_11 = arith.constant 0 : index
      %12 = vector.load %arg7[%c0_10, %c0_11] : memref<64x128xf32, #tpu.memory_space<vmem>>, vector<64x128xf32>
      %c0_12 = arith.constant 0 : index
      %c0_13 = arith.constant 0 : index
      %13 = vector.load %arg4[%c0_12, %c0_13] : memref<64x128xf32, #tpu.memory_space<vmem>>, vector<64x128xf32>
      tpu.vector_store %arg4[%c0_12, %c0_13], %12 {strides = array<i32>} : memref<64x128xf32, #tpu.memory_space<vmem>>, vector<64x128xf32>,
      %cst_14 = arith.constant dense<0.000000e+00> : vector<128xf32>
      %14 = vector.multi_reduction <add>, %12, %cst_14 [0] : vector<64x128xf32> to vector<128xf32>
      %15 = vector.shape_cast %14 : vector<128xf32> to vector<1x128xf32>
      %cst_15 = arith.constant 6.400000e+01 : f32
      %16 = vector.broadcast %cst_15 : f32 to vector<1x128xf32>
      %17 = arith.divf %15, %16 : vector<1x128xf32>
      %18 = vector.broadcast %17 : vector<1x128xf32> to vector<64x128xf32>
      %19 = arith.subf %12, %18 : vector<64x128xf32>
      %20 = vector.shape_cast %17 : vector<1x128xf32> to vector<1x1x128xf32>
      %c0_16 = arith.constant 0 : index
      %c0_17 = arith.constant 0 : index
      %c0_18 = arith.constant 0 : index
      %21 = vector.load %arg5[%c0_16, %c0_17, %c0_18] : memref<1x1x128xf32, #tpu.memory_space<vmem>>, vector<1x1x128xf32>
      tpu.vector_store %arg5[%c0_16, %c0_17, %c0_18], %20 {strides = array<i32>} : memref<1x1x128xf32, #tpu.memory_space<vmem>>, vector<1x1x128xf32>,
      %22 = arith.mulf %19, %19 : vector<64x128xf32>
      %cst_19 = arith.constant dense<0.000000e+00> : vector<128xf32>
      %23 = vector.multi_reduction <add>, %22, %cst_19 [0] : vector<64x128xf32> to vector<128xf32>
      %24 = vector.shape_cast %23 : vector<128xf32> to vector<1x128xf32>
      %25 = vector.shape_cast %24 : vector<1x128xf32> to vector<1x1x128xf32>
      %c0_20 = arith.constant 0 : index
      %c0_21 = arith.constant 0 : index
      %c0_22 = arith.constant 0 : index
      %26 = vector.load %arg6[%c0_20, %c0_21, %c0_22] : memref<1x1x128xf32, #tpu.memory_space<vmem>>, vector<1x1x128xf32>
      tpu.vector_store %arg6[%c0_20, %c0_21, %c0_22], %25 {strides = array<i32>} : memref<1x1x128xf32, #tpu.memory_space<vmem>>, vector<1x1x128xf32>,
    } else {
    }
    return
  }
  func.func @transform_0(%arg0: i32, %arg1: i32) -> (i32, i32) {
    %c0_i32 = arith.constant 0 : i32
    return %arg0, %arg1 : i32, i32
  }
  func.func @transform_1(%arg0: i32, %arg1: i32) -> (i32, i32) {
    %c0_i32 = arith.constant 0 : i32
    %c0_i32_0 = arith.constant 0 : i32
    return %arg1, %c0_i32 : i32, i32
  }
  func.func @transform_2(%arg0: i32, %arg1: i32) -> (i32, i32) {
    %c0_i32 = arith.constant 0 : i32
    %c0_i32_0 = arith.constant 0 : i32
    return %arg0, %c0_i32 : i32, i32
  }
  func.func @transform_3(%arg0: i32, %arg1: i32) -> (i32, i32, i32) {
    %c0_i32 = arith.constant 0 : i32
    %c0_i32_0 = arith.constant 0 : i32
    %c0_i32_1 = arith.constant 0 : i32
    return %arg0, %c0_i32, %c0_i32_0 : i32, i32, i32
  }
  func.func @transform_4(%arg0: i32, %arg1: i32) -> (i32, i32, i32) {
    %c0_i32 = arith.constant 0 : i32
    %c0_i32_0 = arith.constant 0 : i32
    %c0_i32_1 = arith.constant 0 : i32
    return %arg0, %c0_i32, %c0_i32_0 : i32, i32, i32
  }
}

</mosaic_0001>

<bundles_post_ra>
// kernel: tpu_custom_call.1
= control target key start
LH: loop header
LB: loop body
LE: loop exit
PB: predicated region body
PF: predicated region fallthrough
CT: control target
= control target key end

     0   :  { %s1285_s0 = inlined_call_operand.hbm [shape: f32[128,128], index: 0, kind: input, shape index: {}]   ;;  %s1286_s1 = inlined_call_operand.hbm [shape: f32[128,128], index: 1, kind: input, shape index: {}]   ;;  %s1287_s2 = inlined_call_operand.hbm [shape: f32[128,128], index: 2, kind: output, shape index: {0}]   ;;  %s1288_s3 = inlined_call_operand.hbm [shape: f32[2,1,128], index: 3, kind: output, shape index: {1}]   ;;  %s1289_s4 = inlined_call_operand.hbm [shape: f32[2,1,128], index: 4, kind: output, shape index: {2}]  }
   0x1   :  { %1294 = sst [smem:[#allocation17_spill]] %s1286_s1 }
   0x2   :  { %10 = vsyncpa [#allocation4], 0 }
   0x3   :  { %12 = vsyncpa [#allocation4 + $0x1], 0 }
   0x4   :  { %13 = vsyncpa [#allocation7], 0 }
   0x5   :  { %14 = vsyncpa [#allocation5], 0 }
   0x6   :  { %16 = vsyncpa [#allocation5 + $0x1], 0 }
   0x7   :  { %17 = vsyncpa [#allocation10], 0 }
   0x8   :  { %19 = vsyncpa [#allocation10 + $0x1], 0  ;;  %s1043_s15 = smov 0   ;;  %s1045_s16 = smov 0  }
   0x9   :  { %s1047_s17 = smov 0   ;;  %s1049_s18 = smov 0  }
   0xa   :  { %s1051_s19 = smov 0   ;;  %s1053_s20 = smov 0  }
   0xb LB: > { %s1074_s21 = sadd.s32 4294967295, %s1010_s20   ;;  %s1290_s22 = sadd.s32 4294967294, %s1010_s20   ;;  %s1010_s20 = sphi %s1053_s20, %s25_s20   ;;  %s1006_s19 = sphi %s1051_s19, %s1310_s19   ;;  %s1002_s18 = sphi %s1049_s18, %s1309_s18   ;;  %s998_s17 = sphi %s1047_s17, %s1308_s17   ;;  %s994_s16 = sphi %s1045_s16, %s1307_s16   ;;  %s990_s15 = sphi %s1043_s15, %s1306_s15  }
   0xc   : > { %p59_p0 = scmp.ne.s32.totalorder %s994_s16, %s990_s15  ;;  %p60_p1 = scmp.eq.s32.totalorder %s1074_s21, 0 }
   0xd   : > { %p109_p2 = scmp.eq.s32.totalorder %s1074_s21, 1  ;;  %p115_p3 = scmp.eq.s32.totalorder %s1290_s22, 1 }
   0xe   : > { %p1085_p4 = por %p60_p1, %p59_p0  ;;  %p649_p5 = scmp.ge.s32.totalorder %s1010_s20, 1 }
   0xf   : > { %p1090_p6 = por %p115_p3, %p59_p0  ;;  %p174_p7 = scmp.lt.s32.totalorder %s1010_s20, 3 }
  0x10   : > { %s1297_s1 = sld [smem:[#allocation17_spill]]  ;;  %s1012_s29 = smov [#allocation6]  }
  0x11   : > { %p1098_p8 = pnand %p649_p5, %p174_p7  ;;  %s190_s30 = sshll.u32 %s1012_s29, 4  ;;  %s191_s30 = int_to_ptr.vmem [resolvable:$true] %s190_s30 }
  0x12   : > { %p651_p11 = scmp.ge.s32.totalorder %s1010_s20, 2  ;;  %s1291_s5 = smov 128  }
  0x13   : > { %p726_p9 = pneg %p1098_p8  ;;  %s1292_s6 = smov 8  }
  0x14   : > { %s37_s7 = sadd.s32 1, %s1006_s19  ;;  %s46_s8 = sadd.s32 1, %s998_s17 }
  0x15   : > { %p727_p10 = pnand %p726_p9, %p60_p1  ;;  %p39_p12 = scmp.ge.s32.totalorder %s37_s7, 2 }
  0x16   : > { %s188_s27 = sshll.u32 %s1297_s1, 4  ;;  %p53_p13 = scmp.ne.s32.totalorder %s998_s17, %s994_s16  ;;  %s189_s27 = int_to_ptr.hbm [resolvable:$true] %s188_s27 }
  0x17   : > { %729 = dma.hbm_to_vmem [thread:$0]  (!%p727_p10), %s189_s27, 2048, %s191_s30, [#allocation7], %s1291_s5, %s1291_s5, %s1292_s6  }
  0x18   : > { %p54_p0 = scmp.eq.s32.totalorder %s1010_s20, 0  ;;  %s1312_s7 = smov (%p39_p12, %s37_s7), 0 }
  0x19   : > { %1299 = sst [smem:[#allocation16_spill]] %s1312_s7  ;;  %p1123_p5 = por %p109_p2, %p53_p13 }
  0x1a   : > { %p1117_p3 = por %p54_p0, %p53_p13  ;;  %s41_s11 = ssub.s32 %s1006_s19, %s1312_s7 }
  0x1b   : > { %p745_p7 = scmp.lt.s32.totalorder %s1010_s20, 2  ;;  %p44_p9 = scmp.eq.s32.totalorder %s41_s11, 0 }
  0x1c   : > { %s204_s12 = sand.u32 1, %s998_s17   ;;  %s664_s25 = sshll.u32 %s1006_s19, 6 }
  0x1d   : > { %s652_s13 = sshll.u32 %s204_s12, 6  ;;  %s214_s29 = scalar_lea.hbm %s1285_s0, %s664_s25 }
  0x1e   : > { %s1132_s14 = scalar_select %p44_p9, %s998_s17, %s46_s8  }
  0x1f   : > { %s208_s30 = scalar_lea.vmem [#allocation3], %s652_s13  ;;  %s215_s5 = sshll.u32 %s214_s29, 4  ;;  %s216_s5 = int_to_ptr.hbm [resolvable:$true] %s215_s5 }
  0x20   : > { %s217_s22 = sshll.u32 %s208_s30, 4  ;;  %p731_p2 = pnand %p745_p7, %p1117_p3  ;;  %s218_s22 = int_to_ptr.vmem [resolvable:$true] %s217_s22 }
  0x21   : > { %s205_s6 = scalar_lea.sflag [#allocation4], %s204_s12  ;;  %s1302_s1 = smov 8  }
  0x22   : > { %s1303_s7 = smov 128   ;;  %229 = sbr.rel (%p1098_p8) target bundleno = 269 (0x10d), region = 28 }
  0x23   : > { %733 = dma.hbm_to_vmem [thread:$0]  (!%p731_p2), %s216_s5, 1024, %s218_s22, %s205_s6, %s1303_s7, %s1303_s7, %s1302_s1  }
  0x24   : > { %s1146_s8 = sand.u32 (!%p1098_p8), 1, %s994_s16  }
  0x25   : > { %s656_s11 = sshll.u32 (!%p1098_p8), %s1146_s8, 6  ;;  %s232_s13 = scalar_lea.sflag (!%p1098_p8), [#allocation4], %s1146_s8 }
  0x26   : > { %s1152_s9 = scalar_lea.vmem (!%p1098_p8), [#allocation3], %s656_s11 }
  0x27   : > { %973 = dma.done.wait (%p1085_p4), %s232_s13, 1024  }
  0x28   : > { %975 = vsyncadd (%p1085_p4), %s232_s13, 4294966272 }
  0x29   : > { %977 = dma.done.wait (%p60_p1), [#allocation7], 2048  }
  0x2a   : > { %979 = vsyncadd (%p60_p1), [#allocation7], 4294965248  ;;  %v320_v0 = vld [vmem:[#allocation6 + $0x78] sm:$0xff]  ;;  %v319_v1 = vld [vmem:[#allocation6 + $0x70] sm:$0xff]  ;;  %s261_s1 = scalar_lea.vmem [#allocation8], %s656_s11  ;;  %s665_s22 = sshll.u32 %s1002_s18, 6 }
  0x2b   : > { %321 = vmatpush.msra.mxu0 %v320_v0  ;;  %667 = vmatpush.msra.mxu2 %v320_v0  ;;  %v318_v2 = vld [vmem:[#allocation6 + $0x68] sm:$0xff]  ;;  %v317_v3 = vld [vmem:[#allocation6 + $0x60] sm:$0xff]  ;;  %v316_v4 = vld [vmem:[#allocation6 + $0x58] sm:$0xff]  ;;  %v1015_v27 = vmov 64.0   ;;  %s469_s5 = scalar_lea.hbm %s1287_s2, %s665_s22  ;;  %s470_s6 = sshll.u32 %s261_s1, 4  ;;  %s1193_s6 = int_to_ptr.vmem [resolvable:$true] %s470_s6 }
  0x2c   : > { %666 = vmatpush.msra.mxu1 %v320_v0  ;;  %668 = vmatpush.msra.mxu3 %v320_v0  ;;  %v315_v5 = vld [vmem:[#allocation6 + $0x50] sm:$0xff]  ;;  %v314_v6 = vld [vmem:[#allocation6 + $0x48] sm:$0xff]  ;;  %v313_v7 = vld [vmem:[#allocation6 + $0x40] sm:$0xff]  ;;  %802 = vrcp.f32 %v1015_v27  ;;  %s472_s7 = sshll.u32 %s469_s5, 4  ;;  %s450_s12 = scalar_lea.sflag [#allocation5], %s1146_s8  ;;  %s473_s7 = int_to_ptr.hbm [resolvable:$true] %s472_s7 }
  0x2d   : > { %322 = vmatpush.msra.mxu0 %v319_v1  ;;  %670 = vmatpush.msra.mxu2 %v319_v1  ;;  %v312_v8 = vld [vmem:[#allocation6 + $0x38] sm:$0xff]  ;;  %v311_v9 = vld [vmem:[#allocation6 + $0x30] sm:$0xff]  ;;  %v310_v10 = vld [vmem:[#allocation6 + $0x28] sm:$0xff]  ;;  %s878_s25 = sshra.s32 %s473_s7, 4  ;;  %s884_s30 = scalar_lea.hbm %s1287_s2, 128  ;;  %s879_s25 = int_to_ptr.hbm [resolvable:$true] %s878_s25 }
  0x2e   : > { %669 = vmatpush.msra.mxu1 %v319_v1  ;;  %671 = vmatpush.msra.mxu3 %v319_v1  ;;  %v309_v11 = vld [vmem:[#allocation6 + $0x20] sm:$0xff]  ;;  %v308_v12 = vld [vmem:[#allocation6 + $0x18] sm:$0xff]  ;;  %v307_v13 = vld [vmem:[#allocation6 + $0x10] sm:$0xff]  ;;  %s880_s26 = scalar_lea.hbm %s879_s25, 64  ;;  %p885_p10 = scmp.lt.s32.totalorder %s879_s25, %s1287_s2 }
  0x2f   : > { %323 = vmatpush.msra.mxu0 %v318_v2  ;;  %673 = vmatpush.msra.mxu2 %v318_v2  ;;  %v306_v14 = vld [vmem:[#allocation6 + $0x8] sm:$0xff]  ;;  %v305_v15 = vld [vmem:[#allocation6] sm:$0xff]  ;;  %v299_v18 = vld [vmem:[%s1152_s9 + $0x10] sm:$0xff]  ;;  %p881_p1 = scmp.ne.s32.totalorder %s879_s25, %s880_s26  ;;  %p886_p12 = scmp.lt.s32.totalorder %s884_s30, %s880_s26 }
  0x30   : > { %672 = vmatpush.msra.mxu1 %v318_v2  ;;  %674 = vmatpush.msra.mxu3 %v318_v2  ;;  %v297_v16 = vld [vmem:[%s1152_s9] sm:$0xff]  ;;  %v303_v19 = vld [vmem:[%s1152_s9 + $0x30] sm:$0xff]  ;;  %v298_v20 = vld [vmem:[%s1152_s9 + $0x8] sm:$0xff] }
  0x31   : > { %324 = vmatpush.msra.mxu0 %v317_v3  ;;  %676 = vmatpush.msra.mxu2 %v317_v3  ;;  %v301_v17 = vld [vmem:[%s1152_s9 + $0x20] sm:$0xff]  ;;  %v302_v21 = vld [vmem:[%s1152_s9 + $0x28] sm:$0xff]  ;;  %v300_v22 = vld [vmem:[%s1152_s9 + $0x18] sm:$0xff]  ;;  %p882_p4 = pnand %p881_p1, %p1123_p5  ;;  %p887_p13 = por %p886_p12, %p885_p10 }
  0x32   : > { %675 = vmatpush.msra.mxu1 %v317_v3  ;;  %677 = vmatpush.msra.mxu3 %v317_v3  ;;  %v304_v23 = vld [vmem:[%s1152_s9 + $0x38] sm:$0xff]  ;;  %v803_v33 = vpop.eup %802 }
  0x33   : > { %325 = vmatpush.msra.mxu0 %v316_v4  ;;  %679 = vmatpush.msra.mxu2 %v316_v4  ;;  %v411_v38 = vmul.f32 64.0, %v803_v33  ;;  %p883_p8 = pneg %p882_p4 }
  0x34   : > { %678 = vmatpush.msra.mxu1 %v316_v4  ;;  %680 = vmatpush.msra.mxu3 %v316_v4 }
  0x35   : > { %326 = vmatpush.msra.mxu0 %v315_v5  ;;  %682 = vmatpush.msra.mxu2 %v315_v5  ;;  %p888_p0 = pnand %p887_p13, %p883_p8 }
  0x36   : > { %681 = vmatpush.msra.mxu1 %v315_v5  ;;  %683 = vmatpush.msra.mxu3 %v315_v5 }
  0x37   : > { %327 = vmatpush.msra.mxu0 %v314_v6  ;;  %685 = vmatpush.msra.mxu2 %v314_v6 }
  0x38   : > { %684 = vmatpush.msra.mxu1 %v314_v6  ;;  %686 = vmatpush.msra.mxu3 %v314_v6 }
  0x39   : > { %328 = vmatpush.msra.mxu0 %v313_v7  ;;  %688 = vmatpush.msra.mxu2 %v313_v7 }
  0x3a   : > { %687 = vmatpush.msra.mxu1 %v313_v7  ;;  %689 = vmatpush.msra.mxu3 %v313_v7 }
  0x3b   : > { %329 = vmatpush.msra.mxu0 %v312_v8  ;;  %691 = vmatpush.msra.mxu2 %v312_v8 }
  0x3c   : > { %690 = vmatpush.msra.mxu1 %v312_v8  ;;  %692 = vmatpush.msra.mxu3 %v312_v8 }
  0x3d   : > { %330 = vmatpush.msra.mxu0 %v311_v9  ;;  %694 = vmatpush.msra.mxu2 %v311_v9 }
  0x3e   : > { %693 = vmatpush.msra.mxu1 %v311_v9  ;;  %695 = vmatpush.msra.mxu3 %v311_v9 }
  0x3f   : > { %331 = vmatpush.msra.mxu0 %v310_v10  ;;  %697 = vmatpush.msra.mxu2 %v310_v10 }
  0x40   : > { %696 = vmatpush.msra.mxu1 %v310_v10  ;;  %698 = vmatpush.msra.mxu3 %v310_v10 }
  0x41   : > { %332 = vmatpush.msra.mxu0 %v309_v11  ;;  %700 = vmatpush.msra.mxu2 %v309_v11 }
  0x42   : > { %699 = vmatpush.msra.mxu1 %v309_v11  ;;  %701 = vmatpush.msra.mxu3 %v309_v11 }
  0x43   : > { %333 = vmatpush.msra.mxu0 %v308_v12  ;;  %703 = vmatpush.msra.mxu2 %v308_v12 }
  0x44   : > { %702 = vmatpush.msra.mxu1 %v308_v12  ;;  %704 = vmatpush.msra.mxu3 %v308_v12 }
  0x45   : > { %334 = vmatpush.msra.mxu0 %v307_v13  ;;  %706 = vmatpush.msra.mxu2 %v307_v13 }
  0x46   : > { %705 = vmatpush.msra.mxu1 %v307_v13  ;;  %707 = vmatpush.msra.mxu3 %v307_v13 }
  0x47   : > { %335 = vmatpush.msra.mxu0 %v306_v14  ;;  %709 = vmatpush.msra.mxu2 %v306_v14 }
  0x48   : > { %708 = vmatpush.msra.mxu1 %v306_v14  ;;  %710 = vmatpush.msra.mxu3 %v306_v14 }
  0x49   : > { %336 = vmatpush.msra.mxu0 %v305_v15  ;;  %712 = vmatpush.msra.mxu2 %v305_v15 }
  0x4a   : > { %337 = vmatmul.f32.vlgmr.msra.gmra.mxu0 %v297_v16  ;;  %349 = vmatmul.f32.vlgmr.msra.gmra.mxu2 %v301_v17 }
  0x4b   : > { %711 = vmatpush.msra.mxu1 %v305_v15  ;;  %713 = vmatpush.msra.mxu3 %v305_v15 }
  0x4c   : > { %343 = vmatmul.f32.vlgmr.msra.gmra.mxu1 %v299_v18  ;;  %355 = vmatmul.f32.vlgmr.msra.gmra.mxu3 %v303_v19 }
  0x52   : > { %340 = vmatmul.f32.gmra.mxu0 %v298_v20  ;;  %352 = vmatmul.f32.gmra.mxu2 %v302_v21 }
  0x54   : > { %346 = vmatmul.f32.gmra.mxu1 %v300_v22  ;;  %358 = vmatmul.f32.gmra.mxu3 %v304_v23 }
  0xc7   : > { %v1170_v24 = vpop.f32.mrf.mxu0 }
  0xc8   : > { %389 = vst [vmem:[%s261_s1] sm:$0xff] %v1170_v24 }
  0xc9   : > { %v1175_v25 = vpop.f32.mrf.mxu1 }
  0xca   : > { %391 = vst [vmem:[%s261_s1 + $0x10] sm:$0xff] %v1175_v25 }
  0xcd   : > { %v1178_v26 = vpop.f32.mrf.mxu2 }
  0xce   : > { %393 = vst [vmem:[%s261_s1 + $0x20] sm:$0xff] %v1178_v26 }
  0xcf   : > { %v341_v28 = vpop.f32.mrf.mxu0  ;;  %v1182_v29 = vpop.f32.mrf.mxu3 }
  0xd0   : > { %390 = vst [vmem:[%s261_s1 + $0x8] sm:$0xff] %v341_v28  ;;  %v397_v30 = vadd.f32 %v341_v28, %v1170_v24 }
  0xd1   : > { %v1188_v31 = vpop.f32.mrf.mxu1  ;;  %395 = vst [vmem:[%s261_s1 + $0x30] sm:$0xff] %v1182_v29 }
  0xd2   : > { %392 = vst [vmem:[%s261_s1 + $0x18] sm:$0xff] %v1188_v31  ;;  %v398_v32 = vadd.f32 %v397_v30, %v1175_v25 }
  0xd4   : > { %v399_v34 = vadd.f32 %v398_v32, %v1188_v31 }
  0xd5   : > { %v1196_v35 = vpop.f32.mrf.mxu2 }
  0xd6   : > { %394 = vst [vmem:[%s261_s1 + $0x28] sm:$0xff] %v1196_v35  ;;  %v400_v36 = vadd.f32 %v399_v34, %v1178_v26 }
  0xd7   : > { %v1200_v37 = vpop.f32.mrf.mxu3 }
  0xd8   : > { %v401_v39 = vadd.f32 %v400_v36, %v1196_v35  ;;  %396 = vst [vmem:[%s261_s1 + $0x38] sm:$0xff] %v1200_v37 }
  0xd9   : > { %891 = shalt.err (!%p888_p0)
}
  0xda   : > { %s1016_s9 = smov 128   ;;  %s1017_s1 = smov 8   ;;  %v402_v40 = vadd.f32 %v401_v39, %v1182_v29  ;;  %v412_v41 = vsub.f32 1.0, %v411_v38  ;;  %vm415_vm0 = vweird.f32 %v803_v33 }
  0xdb   : > { %720 = dma.vmem_to_hbm [thread:$0]  (%p1123_p5), %s1193_s6, 1024, %s473_s7, %s450_s12, %s1016_s9, %s1016_s9, %s1017_s1  }
  0xdc   : > { %v403_v42 = vadd.f32 %v402_v40, %v1200_v37  ;;  %v413_v44 = vmul.f32 %v803_v33, %v412_v41  ;;  %s484_s28 = scalar_lea.hbm %s1288_s3, %s1002_s18  ;;  %s454_s5 = sand.u32 1, %s1074_s21  }
  0xdd   : > { %s267_s6 = scalar_lea.vmem [#allocation9], %s1146_s8  ;;  %s488_s12 = sshll.u32 %s484_s28, 4  ;;  %s489_s12 = int_to_ptr.hbm [resolvable:$true] %s488_s12 }
  0xde   : > { %v404_v43 = vrot.slane %v403_v42, 4  ;;  %v414_v47 = vadd.f32 %v803_v33, %v413_v44  ;;  %s486_s7 = sshll.u32 %s267_s6, 4  ;;  %s1226_s25 = scalar_lea.sflag [#allocation10], %s454_s5  ;;  %s487_s7 = int_to_ptr.vmem [resolvable:$true] %s486_s7 }
  0xdf   : > { %s906_s26 = sshra.s32 %s489_s12, 4  ;;  %s912_s30 = scalar_lea.hbm %s1288_s3, 2  ;;  %s907_s26 = int_to_ptr.hbm [resolvable:$true] %s906_s26 }
  0xe0   : > { %v405_v45 = vadd.f32 %v404_v43, %v403_v42  ;;  %v416_v50 = vsel %vm415_vm0, %v803_v33, %v414_v47  ;;  %s908_s21 = scalar_lea.hbm %s907_s26, 1  ;;  %p913_p2 = scmp.lt.s32.totalorder %s907_s26, %s1288_s3 }
  0xe1   : > { %p909_p3 = scmp.ne.s32.totalorder %s907_s26, %s908_s21  ;;  %p914_p1 = scmp.lt.s32.totalorder %s912_s30, %s908_s21 }
  0xe2   : > { %v406_v46 = vrot.slane %v405_v45, 2 }
  0xe3   : > { %p910_p7 = pnand %p909_p3, %p1123_p5  ;;  %p915_p4 = por %p914_p1, %p913_p2 }
  0xe4   : > { %v407_v48 = vadd.f32 %v406_v46, %v405_v45 }
  0xe5   : > { %p911_p9 = pneg %p910_p7 }
  0xe6   : > { %v408_v49 = vrot.slane %v407_v48, 1 }
  0xe7   : > { %p916_p8 = pnand %p915_p4, %p911_p9 }
  0xe8   : > { %v409_v51 = vadd.f32 %v408_v49, %v407_v48 }
  0xea   : > { %v417_v52 = vmul.f32 %v416_v50, %v409_v51 }
  0xec   : > { %v418_v53 = vsub.f32 %v1170_v24, %v417_v52  ;;  %v419_v54 = vsub.f32 %v341_v28, %v417_v52  ;;  %v420_v55 = vsub.f32 %v1175_v25, %v417_v52  ;;  %426 = vst [vmem:[%s267_s6] sm:$0x1] %v417_v52 }
  0xed   : > { %919 = shalt.err (!%p916_p8)
}
  0xee   : > { %721 = dma.vmem_to_hbm [thread:$0]  (%p1123_p5), %s487_s7, 16, %s489_s12, %s1226_s25   ;;  %v421_v56 = vsub.f32 %v1188_v31, %v417_v52  ;;  %v427_v57 = vmul.f32 %v418_v53, %v418_v53  ;;  %v428_v58 = vmul.f32 %v419_v54, %v419_v54  ;;  %v422_v59 = vsub.f32 %v1178_v26, %v417_v52 }
  0xef   : > { %v429_v60 = vmul.f32 %v420_v55, %v420_v55  ;;  %v423_v62 = vsub.f32 %v1196_v35, %v417_v52  ;;  %v424_v1 = vsub.f32 %v1182_v29, %v417_v52  ;;  %v425_v4 = vsub.f32 %v1200_v37, %v417_v52  ;;  %s497_s22 = scalar_lea.hbm %s1289_s4, %s1002_s18  ;;  %s273_s23 = scalar_lea.vmem [#allocation11], %s1146_s8 }
  0xf0   : > { %v435_v61 = vadd.f32 %v428_v58, %v427_v57  ;;  %v430_v63 = vmul.f32 %v421_v56, %v421_v56  ;;  %v431_v2 = vmul.f32 %v422_v59, %v422_v59  ;;  %s499_s28 = sshll.u32 %s273_s23, 4  ;;  %s501_s5 = sshll.u32 %s497_s22, 4  ;;  %s500_s28 = int_to_ptr.vmem [resolvable:$true] %s499_s28  ;;  %s502_s5 = int_to_ptr.hbm [resolvable:$true] %s501_s5 }
  0xf1   : > { %v432_v5 = vmul.f32 %v423_v62, %v423_v62  ;;  %v433_v7 = vmul.f32 %v424_v1, %v424_v1  ;;  %v434_v9 = vmul.f32 %v425_v4, %v425_v4  ;;  %s934_s6 = sshra.s32 %s502_s5, 4  ;;  %s940_s18 = scalar_lea.hbm %s1289_s4, 2  ;;  %s935_s6 = int_to_ptr.hbm [resolvable:$true] %s934_s6 }
  0xf2   : > { %v436_v0 = vadd.f32 %v435_v61, %v429_v60  ;;  %s936_s7 = scalar_lea.hbm %s935_s6, 1  ;;  %p941_p0 = scmp.lt.s32.totalorder %s935_s6, %s1289_s4 }
  0xf3   : > { %p937_p10 = scmp.ne.s32.totalorder %s935_s6, %s936_s7  ;;  %p942_p3 = scmp.lt.s32.totalorder %s940_s18, %s936_s7 }
  0xf4   : > { %v437_v3 = vadd.f32 %v436_v0, %v430_v63 }
  0xf5   : > { %p938_p12 = pnand %p937_p10, %p1123_p5  ;;  %p943_p7 = por %p942_p3, %p941_p0 }
  0xf6   : > { %v438_v6 = vadd.f32 %v437_v3, %v431_v2 }
  0xf7   : > { %p939_p13 = pneg %p938_p12 }
  0xf8   : > { %v439_v8 = vadd.f32 %v438_v6, %v432_v5 }
  0xf9   : > { %p944_p9 = pnand %p943_p7, %p939_p13 }
  0xfa   : > { %v440_v10 = vadd.f32 %v439_v8, %v433_v7 }
  0xfc   : > { %v441_v11 = vadd.f32 %v440_v10, %v434_v9 }
  0xfe   : > { %v442_v12 = vrot.slane %v441_v11, 4 }
 0x100   : > { %v443_v13 = vadd.f32 %v442_v12, %v441_v11 }
 0x102   : > { %v444_v14 = vrot.slane %v443_v13, 2 }
 0x104   : > { %v445_v15 = vadd.f32 %v444_v14, %v443_v13 }
 0x106   : > { %v446_v16 = vrot.slane %v445_v15, 1 }
 0x108   : > { %v447_v17 = vadd.f32 %v446_v16, %v445_v15 }
 0x10a   : > { %448 = vst [vmem:[%s273_s23] sm:$0x1] %v447_v17 }
 0x10b   : > { %947 = shalt.err (!%p944_p9)
}
 0x10c   : > { %722 = dma.vmem_to_hbm [thread:$0]  (%p1123_p5), %s500_s28, 16, %s502_s5, %s1226_s25  }
 0x10d PF: > { %s513_s27 = sand.u32 1, %s990_s15   ;;  %p735_p2 = pnand %p651_p11, %p1090_p6 }
 0x10e   : > { %s514_s29 = scalar_lea.sflag [#allocation5], %s513_s27 }
 0x10f   : > { %p736_p1 = pneg %p735_p2 }
 0x111   : > { %981 = dma.done.wait (%p736_p1), %s514_s29, 1024  }
 0x112   : > { %983 = vsyncadd (%p736_p1), %s514_s29, 4294966272  ;;  %s1304_s30 = sadd.s32 4294967294, %s1010_s20  }
 0x113   : > { %s523_s11 = sand.u32 1, %s1304_s30  }
 0x114   : > { %s524_s13 = scalar_lea.sflag [#allocation10], %s523_s11 }
 0x115   : > { %985 = dma.done.wait (%p736_p1), %s524_s13, 32  }
 0x116   : > { %987 = vsyncadd (%p736_p1), %s524_s13, 4294967264  ;;  %s25_s20 = sadd.s32 1, %s1010_s20   ;;  %s1305_s24 = sld [smem:[#allocation16_spill]] }
 0x117   : > { %p22_p5 = scmp.ge.s32.totalorder %s25_s20, 4   ;;  %s1306_s15 = smov %s994_s16 }
 0x118   : > { %s1307_s16 = smov %s998_s17  ;;  %s1308_s17 = smov %s1132_s14 }
 0x119   : > { %s1309_s18 = smov %s1006_s19  ;;  %24 = sbr.rel (!%p22_p5) target bundleno = 11 (0xb), region = 118 }
 0x11c   : > { %s1310_s19 = smov %s1305_s24 }
 0x11e   :  { %538 = vsyncpa [#allocation4], 1 }
 0x11f   :  { %540 = vsyncpa [#allocation4 + $0x1], 1 }
 0x120   :  { %541 = vsyncpa [#allocation7], 1 }
 0x121   :  { %542 = vsyncpa [#allocation5], 1 }
 0x122   :  { %544 = vsyncpa [#allocation5 + $0x1], 1 }
 0x123   :  { %545 = vsyncpa [#allocation10], 1 }
 0x124   :  { %547 = vsyncpa [#allocation10 + $0x1], 1 }

</bundles_post_ra>
